<compile_context>
chip_gen: v6e
topology: v6e:2x2x1
jax: 0.10.0
libtpu: 0.0.40
codegen_flags: <defaults>
</compile_context>

<pallas_src>
import functools

import jax
import jax.numpy as jnp
from jax.experimental import pallas as pl
from jax.experimental.pallas import tpu as pltpu


_DEFAULT_TILE_ROWS = 512                 # multiple of 8 (f32 sublane packing)
_VMEM_LIMIT_BYTES = 32 * 1024 * 1024     # safe on v5e/v6e (128 MiB) and v7x (64 MiB)


# ------------------------------ small helpers -------------------------------
def _row_tiles(n, tile_rows):
    """Pick a row tile: either a multiple of 8, or the full row extent."""
    tile = min(int(tile_rows), int(n))
    if tile != n:
        tile = max(8, (tile // 8) * 8)
    return tile, pl.cdiv(n, tile)


def _compiler_params():
    return pltpu.CompilerParams(
        dimension_semantics=("parallel",),
        vmem_limit_bytes=_VMEM_LIMIT_BYTES)


def _cost(flops, bytes_accessed, transcendentals=0):
    return pl.CostEstimate(flops=int(flops), transcendentals=int(transcendentals),
                           bytes_accessed=int(bytes_accessed))


# ----------------------------- LayerNorm kernel -----------------------------
def _layernorm_kernel(x_ref, g_ref, b_ref, o_ref, *, eps):
    x = x_ref[...].astype(jnp.float32)
    g = g_ref[...].astype(jnp.float32)          # (1, H) broadcasts over rows
    b = b_ref[...].astype(jnp.float32)
    mean = jnp.mean(x, axis=-1, keepdims=True)
    xc = x - mean
    var = jnp.mean(xc * xc, axis=-1, keepdims=True)
    inv = jax.lax.rsqrt(var + eps)
    o_ref[...] = (xc * inv * g + b).astype(o_ref.dtype)


def layer_norm(x2d, gamma, beta, *, tile_rows=_DEFAULT_TILE_ROWS, eps=1e-5):
    n, h = x2d.shape
    tile, grid = _row_tiles(n, tile_rows)
    g2d = gamma.reshape(1, h)
    b2d = beta.reshape(1, h)
    itemsize = jnp.dtype(x2d.dtype).itemsize
    return pl.pallas_call(
        functools.partial(_layernorm_kernel, eps=eps),
        out_shape=jax.ShapeDtypeStruct((n, h), x2d.dtype),
        grid=(grid,),
        in_specs=[
            pl.BlockSpec((tile, h), lambda i: (i, 0)),
            pl.BlockSpec((1, h), lambda i: (0, 0)),   # resident across the grid
            pl.BlockSpec((1, h), lambda i: (0, 0)),
        ],
        out_specs=pl.BlockSpec((tile, h), lambda i: (i, 0)),
        compiler_params=_compiler_params(),
        cost_estimate=_cost(flops=9 * n * h, transcendentals=n,
                            bytes_accessed=(2 * n * h + 2 * h) * itemsize),
    )(x2d, g2d, b2d)


# ------------------------- Residual add (eval path) -------------------------
def _residual_add_kernel(x_ref, y_ref, o_ref):
    o = x_ref[...].astype(jnp.float32) + y_ref[...].astype(jnp.float32)
    o_ref[...] = o.astype(o_ref.dtype)


def residual_add(x2d, y2d, *, tile_rows=_DEFAULT_TILE_ROWS):
    n, h = x2d.shape
    tile, grid = _row_tiles(n, tile_rows)
    itemsize = jnp.dtype(x2d.dtype).itemsize
    return pl.pallas_call(
        _residual_add_kernel,
        out_shape=jax.ShapeDtypeStruct((n, h), x2d.dtype),
        grid=(grid,),
        in_specs=[pl.BlockSpec((tile, h), lambda i: (i, 0)),
                  pl.BlockSpec((tile, h), lambda i: (i, 0))],
        out_specs=pl.BlockSpec((tile, h), lambda i: (i, 0)),
        input_output_aliases={0: 0},   # x is dead after the residual add
        compiler_params=_compiler_params(),
        cost_estimate=_cost(flops=n * h, bytes_accessed=3 * n * h * itemsize),
    )(x2d, y2d)


# ------------------ Residual + inverted dropout (train path) ----------------
def _residual_dropout_kernel(x_ref, y_ref, bits_ref, o_ref, *, threshold, scale):
    # keep iff raw uint32 bits >= threshold  (P(keep) = 1 - p); no float chain.
    keep = bits_ref[...] >= jnp.uint32(threshold)
    y = jnp.where(keep, y_ref[...].astype(jnp.float32) * scale, 0.0)
    o_ref[...] = (x_ref[...].astype(jnp.float32) + y).astype(o_ref.dtype)


def residual_dropout(x2d, y2d, key, p, *, tile_rows=_DEFAULT_TILE_ROWS):
    p = float(p)
    if p <= 0.0:
        return residual_add(x2d, y2d, tile_rows=tile_rows)
    n, h = x2d.shape
    tile, grid = _row_tiles(n, tile_rows)
    itemsize = jnp.dtype(x2d.dtype).itemsize
    # TODO(synk): on TPU-only builds, draw the mask in-kernel with
    # pltpu.prng_seed(seed + pl.program_id(0)) / pltpu.prng_random_bits to skip
    # this HBM read; host-side bits are used so the kernel also lowers under
    # CPU interpret mode, and each grid tile still sees unique randomness
    # because the bits operand is tiled exactly like x/y.
    bits = jax.random.bits(key, (n, h), dtype=jnp.uint32)
    threshold = min(int(p * (2 ** 32)), 2 ** 32 - 1)
    scale = 1.0 / (1.0 - p)
    kernel = functools.partial(_residual_dropout_kernel,
                               threshold=threshold, scale=scale)
    return pl.pallas_call(
        kernel,
        out_shape=jax.ShapeDtypeStruct((n, h), x2d.dtype),
        grid=(grid,),
        in_specs=[pl.BlockSpec((tile, h), lambda i: (i, 0)),
                  pl.BlockSpec((tile, h), lambda i: (i, 0)),
                  pl.BlockSpec((tile, h), lambda i: (i, 0))],
        out_specs=pl.BlockSpec((tile, h), lambda i: (i, 0)),
        input_output_aliases={0: 0},
        compiler_params=_compiler_params(),
        cost_estimate=_cost(flops=3 * n * h, bytes_accessed=4 * n * h * itemsize),
    )(x2d, y2d, bits)


# --------------------------- SublayerConnection -----------------------------
class SublayerConnection:
    """Pre-norm residual block: x + Dropout(sublayer(LayerNorm(x)))."""

    def __init__(self, size, dropout):
        self.size = size
        self.p = float(dropout)
        # nn.LayerNorm defaults: weight=1, bias=0 ; stored as (1, H)
        self.gamma = jnp.ones((1, size), jnp.float32)
        self.beta = jnp.zeros((1, size), jnp.float32)

    def __call__(self, x, sublayer, dropout_key=None):
        b, t, h = x.shape
        x2d = x.reshape(b * t, h)
        hid = layer_norm(x2d, self.gamma, self.beta).reshape(b, t, h)
        out = sublayer(hid)
        if isinstance(out, tuple):
            y, extra = out
        else:
            y, extra = out, None
        y2d = y.reshape(b * t, h)
        if dropout_key is not None and self.p > 0.0:      # training mode
            o2d = residual_dropout(x2d, y2d, dropout_key, self.p)
        else:                                             # eval: Dropout = id
            o2d = residual_add(x2d, y2d)
        o = o2d.reshape(b, t, h)
        return o if extra is None else (o, extra)


# ------------------------------ model stand-in ------------------------------
def subsequent_mask(size):
    """[1, size, size] lower-triangular allowed-positions mask (1 = attend)."""
    return jnp.tril(jnp.ones((1, size, size), jnp.int32))


class TinyCodeTransformer:
    """Compact stand-in for `self.model` in the PyTorch GreedyEvaluate spec.

    Exposes the interface the greedy loop needs: generate_code_mask, encode,
    generate_nl_emb, decode, generator. The pre-norm residual sublayers run
    through the Pallas kernels above; attention / projections stay in JAX.
    """
    # TODO(synk): the real `self.model` is an external trained Transformer that
    # is not part of this module's spec; this stand-in only mirrors its API.

    def __init__(self, key, *, hidden=128, heads=4, ffn=256, code_vocab=40,
                 nl_vocab=24, num_rel=12, num_sem=8, max_pos=64, dropout=0.1):
        assert hidden % heads == 0
        self.hidden, self.heads, self.nl_vocab = hidden, heads, nl_vocab
        keys = iter(jax.random.split(key, 32))

        def w(shape, scale=0.02):
            return jax.random.normal(next(keys), shape, jnp.float32) * scale

        # embeddings
        self.code_emb = w((code_vocab, hidden), 0.1)
        self.par_emb = w((num_rel, hidden), 0.1)
        self.bro_emb = w((num_rel, hidden), 0.1)
        self.sem_emb = w((num_sem, hidden), 0.1)
        self.nl_emb_table = w((nl_vocab, hidden), 0.1)
        self.pos_emb = w((max_pos, hidden), 0.1)
        # encoder: self-attention + FFN (pre-norm residual blocks)
        self.enc_wq, self.enc_wk = w((hidden, hidden)), w((hidden, hidden))
        self.enc_wv, self.enc_wo = w((hidden, hidden)), w((hidden, hidden))
        self.enc_w1, self.enc_w2 = w((hidden, ffn)), w((ffn, hidden))
        self.enc_sub = [SublayerConnection(hidden, dropout) for _ in range(2)]
        # decoder: masked self-attention + cross-attention + FFN
        self.dec_wq1, self.dec_wk1 = w((hidden, hidden)), w((hidden, hidden))
        self.dec_wv1, self.dec_wo1 = w((hidden, hidden)), w((hidden, hidden))
        self.dec_wq2, self.dec_wk2 = w((hidden, hidden)), w((hidden, hidden))
        self.dec_wv2, self.dec_wo2 = w((hidden, hidden)), w((hidden, hidden))
        self.dec_w1, self.dec_w2 = w((hidden, ffn)), w((ffn, hidden))
        self.dec_sub = [SublayerConnection(hidden, dropout) for _ in range(3)]
        # generator: vocab head + copy gate over encoder attention
        self.w_vocab = w((hidden, nl_vocab))
        self.w_gate = w((3 * hidden, 1))

    # --- plain-JAX multi-head attention (model-specific, stays outside Pallas)
    def _mha(self, q, k, v, mask):
        bsz, tq, h = q.shape
        d = h // self.heads

        def split(t):
            return t.reshape(bsz, -1, self.heads, d).transpose(0, 2, 1, 3)

        qh, kh, vh = split(q), split(k), split(v)
        scores = jnp.einsum("bhqd,bhkd->bhqk", qh, kh) / jnp.sqrt(float(d))
        if mask is not None:
            scores = jnp.where(mask, -1e9, scores)
        attn = jax.nn.softmax(scores, axis=-1)
        out = jnp.einsum("bhqk,bhkd->bhqd", attn, vh)
        return out.transpose(0, 2, 1, 3).reshape(bsz, tq, h), attn

    def generate_code_mask(self, rel_par, rel_bro, sem_ids):
        pad = (rel_par == 0) & (rel_bro == 0) & (sem_ids == 0)
        return pad[:, None, None, :]          # [B,1,1,S]; True = masked out

    def encode(self, code, rel_par, rel_bro, sem_ids, code_mask):
        x = (self.code_emb[code] + self.par_emb[rel_par]
             + self.bro_emb[rel_bro] + self.sem_emb[sem_ids])

        def self_attn(h):
            out, _ = self._mha(h @ self.enc_wq, h @ self.enc_wk,
                               h @ self.enc_wv, code_mask)
            return out @ self.enc_wo

        x = self.enc_sub[0](x, self_attn)
        x = self.enc_sub[1](x, lambda h: jax.nn.relu(h @ self.enc_w1) @ self.enc_w2)
        return x

    def generate_nl_emb(self, ys):
        t = ys.shape[1]
        return (self.nl_emb_table[ys] * jnp.sqrt(float(self.hidden))
                + self.pos_emb[None, :t, :])

    def decode(self, enc_out, code_mask, nl_emb, nl_mask):
        y = nl_emb

        def self_attn(h):
            out, _ = self._mha(h @ self.dec_wq1, h @ self.dec_wk1,
                               h @ self.dec_wv1, nl_mask)
            return out @ self.dec_wo1

        y = self.dec_sub[0](y, self_attn)

        def cross_attn(h):
            out, attn = self._mha(h @ self.dec_wq2, enc_out @ self.dec_wk2,
                                  enc_out @ self.dec_wv2, code_mask)
            return out @ self.dec_wo2, attn

        y, dec_attn = self.dec_sub[1](y, cross_attn)
        y = self.dec_sub[2](y, lambda h: jax.nn.relu(h @ self.dec_w1) @ self.dec_w2)
        return y, dec_attn                     # dec_attn: [B, heads, T, S_code]

    def generator(self, dec_last, attn_last, enc_out, nl_emb_last,
                  sem_convert_matrix, sem_masks):
        p_vocab = jax.nn.softmax(dec_last @ self.w_vocab, axis=-1)     # [B,1,V]
        copy_attn = attn_last.mean(axis=1) * sem_masks[:, None, :]     # [B,1,S]
        p_copy = jnp.einsum("bts,bsv->btv", copy_attn, sem_convert_matrix)
        context = jnp.einsum("bts,bsh->bth", attn_last.mean(axis=1), enc_out)
        gate = jax.nn.sigmoid(
            jnp.concatenate([dec_last, nl_emb_last, context], axis=-1) @ self.w_gate)
        return gate * p_vocab + (1.0 - gate) * p_copy                  # [B,1,V]


# ------------------------------- GreedyEvaluate ------------------------------
class GreedyEvaluate:
    """Greedy decoding loop matching the PyTorch GreedyEvaluate.forward.

    The token buffer `ys` is kept at its final length (max_nl_len) and filled
    in-place inside a lax.fori_loop; causal masking makes the not-yet-written
    positions inert, so the generated tokens match the PyTorch growing-`ys`
    loop exactly while compiling the whole decode ONCE (no per-step re-trace).
    """

    def __init__(self, model, max_nl_len, start_pos):
        self.model = model
        self.max_nl_len = int(max_nl_len)
        self.start_pos = int(start_pos)
        self._encode = jax.jit(self._encode_impl)
        self._decode_all = jax.jit(self._decode_all_impl)

    def _encode_impl(self, code, rel_par, rel_bro, sem_ids):
        enc_mask = self.model.generate_code_mask(rel_par, rel_bro, sem_ids)
        return self.model.encode(code, rel_par, rel_bro, sem_ids, enc_mask)

    def _decode_all_impl(self, enc_out, code_mask, ys0, sem_convert, sem_masks):
        t_max = self.max_nl_len
        nl_mask = (subsequent_mask(t_max) == 0)[:, None, :, :]     # [1,1,T,T]

        def body(i, ys):
            nl_emb = self.model.generate_nl_emb(ys)
            dec_out, dec_attn = self.model.decode(enc_out, code_mask,
                                                  nl_emb, nl_mask)
            # Last *valid* position is i (tokens 0..i are filled at step i).
            dec_last = jax.lax.dynamic_slice_in_dim(dec_out, i, 1, axis=1)
            attn_last = jax.lax.dynamic_slice_in_dim(dec_attn, i, 1, axis=2)
            nl_last = jax.lax.dynamic_slice_in_dim(nl_emb, i, 1, axis=1)
            prob = self.model.generator(dec_last, attn_last, enc_out, nl_last,
                                        sem_convert, sem_masks)       # [B,1,V]
            next_word = jnp.argmax(prob[:, 0], axis=-1)                # [B]
            return jax.lax.dynamic_update_slice_in_dim(
                ys, next_word[:, None].astype(ys.dtype), i + 1, axis=1)

        return jax.lax.fori_loop(0, t_max - 1, body, ys0)

    def __call__(self, inputs):
        (code, rel_par, rel_bro, sem_ids, sem_convert, sem_masks,
         nl, nl_mask) = inputs
        del nl, nl_mask                       # unused, as in the PyTorch forward
        bsz = code.shape[0]
        code_mask = (code == 0)[:, None, None, :]
        enc_out = self._encode(code, rel_par, rel_bro, sem_ids)
        ys0 = jnp.zeros((bsz, self.max_nl_len), dtype=code.dtype)
        ys0 = ys0.at[:, 0].set(jnp.asarray(self.start_pos, dtype=code.dtype))
        return self._decode_all(enc_out, code_mask, ys0, sem_convert, sem_masks)


# ------------------------------------ main -----------------------------------
if __name__ == "__main__":
    root = jax.random.PRNGKey(0)
    k_model, k_code, k_par, k_bro, k_sem, k_drop, k_chk = jax.random.split(root, 7)

    B, S_CODE, HIDDEN = 2, 16, 128
    MAX_NL_LEN, START_POS = 6, 1
    CODE_VOCAB, NL_VOCAB = 40, 24
    NUM_REL, NUM_SEM = 12, 8

    model = TinyCodeTransformer(k_model, hidden=HIDDEN, heads=4, ffn=256,
                                code_vocab=CODE_VOCAB, nl_vocab=NL_VOCAB,
                                num_rel=NUM_REL, num_sem=NUM_SEM, dropout=0.1)

    code = jax.random.randint(k_code, (B, S_CODE), 1, CODE_VOCAB, dtype=jnp.int32)
    code = code.at[:, -3:].set(0)                       # trailing pad tokens
    rel_par = jax.random.randint(k_par, (B, S_CODE), 0, NUM_REL, dtype=jnp.int32)
    rel_bro = jax.random.randint(k_bro, (B, S_CODE), 0, NUM_REL, dtype=jnp.int32)
    sem_ids = jax.random.randint(k_sem, (B, S_CODE), 0, NUM_SEM, dtype=jnp.int32)
    sem_convert = jax.nn.one_hot(code % NL_VOCAB, NL_VOCAB, dtype=jnp.float32)
    sem_masks = (sem_ids != 0).astype(jnp.float32)
    nl = jnp.zeros((B, MAX_NL_LEN), jnp.int32)
    nl_mask = jnp.ones((B, 1, MAX_NL_LEN), jnp.int32)

    evaluator = GreedyEvaluate(model, MAX_NL_LEN, START_POS)
    ys = evaluator((code, rel_par, rel_bro, sem_ids, sem_convert, sem_masks,
                    nl, nl_mask))
    ys = jax.block_until_ready(ys)
    assert ys.shape == (B, MAX_NL_LEN)
    assert bool(jnp.all(ys[:, 0] == START_POS))
    assert bool(jnp.all((ys >= 0) & (ys < NL_VOCAB)))

    # ---- standalone kernel checks at a multi-tile size (exercises the grid) --
    N, H = 1024, HIDDEN
    kx, ky, kg, kb = jax.random.split(k_chk, 4)
    x = jax.random.normal(kx, (N, H), jnp.float32)
    y = jax.random.normal(ky, (N, H), jnp.float32)
    g = jax.random.normal(kg, (H,), jnp.float32)
    b = jax.random.normal(kb, (H,), jnp.float32)

    ln = jax.jit(layer_norm)(x, g, b)
    mean = jnp.mean(x, axis=-1, keepdims=True)
    var = jnp.var(x, axis=-1, keepdims=True)
    ln_ref = (x - mean) * jax.lax.rsqrt(var + 1e-5) * g + b
    assert bool(jnp.allclose(ln, ln_ref, atol=1e-3, rtol=1e-3))

    add = jax.jit(residual_add)(x, y)
    assert bool(jnp.allclose(add, x + y, atol=1e-5))

    P_DROP = 0.1
    drop = jax.jit(lambda a, c, k: residual_dropout(a, c, k, P_DROP))(x, y, k_drop)
    delta = drop - x
    kept = jnp.isclose(delta, y / (1.0 - P_DROP), atol=1e-4)
    dropped = jnp.isclose(delta, 0.0, atol=1e-6)
    assert bool(jnp.all(kept | dropped))
    keep_frac = float(jnp.mean(kept.astype(jnp.float32)))
    assert 0.8 < keep_frac < 0.97

    jax.block_until_ready((ln, add, drop))
    print("KERNEL_OK")
</pallas_src>

<mosaic_0001>
module attributes {stable_mosaic.version = 11 : i64} {
  func.func @_layernorm_kernel(%arg0: i32, %arg1: memref<32x128xf32, #tpu.memory_space<vmem>>, %arg2: memref<1x128xf32, #tpu.memory_space<vmem>>, %arg3: memref<1x128xf32, #tpu.memory_space<vmem>>, %arg4: memref<32x128xf32, #tpu.memory_space<vmem>>) attributes {dimension_semantics = [#tpu.dimension_semantics<parallel>], iteration_bounds = array<i64: 1>, scalar_prefetch = 0 : i64, scratch_operands = 0 : i64, tpu.core_type = #tpu.core_type<tc>, window_params = [{transform_indices = @transform_0, window_bounds = array<i64: 32, 128>}, {pipeline_mode = #tpu.pipeline_mode<synchronous>, transform_indices = @transform_1, window_bounds = array<i64: 1, 128>}, {pipeline_mode = #tpu.pipeline_mode<synchronous>, transform_indices = @transform_2, window_bounds = array<i64: 1, 128>}, {transform_indices = @transform_3, window_bounds = array<i64: 32, 128>}]} {
    %c0 = arith.constant 0 : index
    %c0_0 = arith.constant 0 : index
    %0 = vector.load %arg1[%c0, %c0_0] : memref<32x128xf32, #tpu.memory_space<vmem>>, vector<32x128xf32>
    %c0_1 = arith.constant 0 : index
    %c0_2 = arith.constant 0 : index
    %1 = vector.load %arg2[%c0_1, %c0_2] : memref<1x128xf32, #tpu.memory_space<vmem>>, vector<1x128xf32>
    %c0_3 = arith.constant 0 : index
    %c0_4 = arith.constant 0 : index
    %2 = vector.load %arg3[%c0_3, %c0_4] : memref<1x128xf32, #tpu.memory_space<vmem>>, vector<1x128xf32>
    %cst = arith.constant dense<0.000000e+00> : vector<32xf32>
    %3 = vector.multi_reduction <add>, %0, %cst [1] : vector<32x128xf32> to vector<32xf32>
    %4 = vector.shape_cast %3 : vector<32xf32> to vector<32x1xf32>
    %cst_5 = arith.constant 1.280000e+02 : f32
    %5 = vector.broadcast %cst_5 : f32 to vector<32x1xf32>
    %6 = arith.divf %4, %5 : vector<32x1xf32>
    %7 = vector.broadcast %6 : vector<32x1xf32> to vector<32x128xf32>
    %8 = arith.subf %0, %7 : vector<32x128xf32>
    %9 = arith.mulf %8, %8 : vector<32x128xf32>
    %cst_6 = arith.constant dense<0.000000e+00> : vector<32xf32>
    %10 = vector.multi_reduction <add>, %9, %cst_6 [1] : vector<32x128xf32> to vector<32xf32>
    %11 = vector.shape_cast %10 : vector<32xf32> to vector<32x1xf32>
    %cst_7 = arith.constant 1.280000e+02 : f32
    %12 = vector.broadcast %cst_7 : f32 to vector<32x1xf32>
    %13 = arith.divf %11, %12 : vector<32x1xf32>
    %cst_8 = arith.constant 9.99999974E-6 : f32
    %14 = vector.broadcast %cst_8 : f32 to vector<32x1xf32>
    %15 = arith.addf %13, %14 : vector<32x1xf32>
    %16 = math.rsqrt %15 : vector<32x1xf32>
    %17 = vector.broadcast %16 : vector<32x1xf32> to vector<32x128xf32>
    %18 = arith.mulf %8, %17 : vector<32x128xf32>
    %19 = vector.broadcast %1 : vector<1x128xf32> to vector<32x128xf32>
    %20 = arith.mulf %18, %19 : vector<32x128xf32>
    %21 = vector.broadcast %2 : vector<1x128xf32> to vector<32x128xf32>
    %22 = arith.addf %20, %21 : vector<32x128xf32>
    %c0_9 = arith.constant 0 : index
    %c0_10 = arith.constant 0 : index
    %23 = vector.load %arg4[%c0_9, %c0_10] : memref<32x128xf32, #tpu.memory_space<vmem>>, vector<32x128xf32>
    tpu.vector_store %arg4[%c0_9, %c0_10], %22 {strides = array<i32>} : memref<32x128xf32, #tpu.memory_space<vmem>>, vector<32x128xf32>,
    return
  }
  func.func @transform_0(%arg0: i32) -> (i32, i32) {
    %c0_i32 = arith.constant 0 : i32
    %c0_i32_0 = arith.constant 0 : i32
    return %arg0, %c0_i32 : i32, i32
  }
  func.func @transform_1(%arg0: i32) -> (i32, i32) {
    %c0_i32 = arith.constant 0 : i32
    %c0_i32_0 = arith.constant 0 : i32
    %c0_i32_1 = arith.constant 0 : i32
    return %c0_i32, %c0_i32_0 : i32, i32
  }
  func.func @transform_2(%arg0: i32) -> (i32, i32) {
    %c0_i32 = arith.constant 0 : i32
    %c0_i32_0 = arith.constant 0 : i32
    %c0_i32_1 = arith.constant 0 : i32
    return %c0_i32, %c0_i32_0 : i32, i32
  }
  func.func @transform_3(%arg0: i32) -> (i32, i32) {
    %c0_i32 = arith.constant 0 : i32
    %c0_i32_0 = arith.constant 0 : i32
    return %arg0, %c0_i32 : i32, i32
  }
}

module attributes {stable_mosaic.version = 11 : i64} {
  func.func @_residual_add_kernel(%arg0: i32, %arg1: memref<32x128xf32, #tpu.memory_space<vmem>>, %arg2: memref<32x128xf32, #tpu.memory_space<vmem>>, %arg3: memref<32x128xf32, #tpu.memory_space<vmem>>) attributes {dimension_semantics = [#tpu.dimension_semantics<parallel>], iteration_bounds = array<i64: 1>, scalar_prefetch = 0 : i64, scratch_operands = 0 : i64, tpu.core_type = #tpu.core_type<tc>, window_params = [{transform_indices = @transform_0, window_bounds = array<i64: 32, 128>}, {transform_indices = @transform_1, window_bounds = array<i64: 32, 128>}, {transform_indices = @transform_2, window_bounds = array<i64: 32, 128>}]} {
    %c0 = arith.constant 0 : index
    %c0_0 = arith.constant 0 : index
    %0 = vector.load %arg1[%c0, %c0_0] : memref<32x128xf32, #tpu.memory_space<vmem>>, vector<32x128xf32>
    %c0_1 = arith.constant 0 : index
    %c0_2 = arith.constant 0 : index
    %1 = vector.load %arg2[%c0_1, %c0_2] : memref<32x128xf32, #tpu.memory_space<vmem>>, vector<32x128xf32>
    %2 = arith.addf %0, %1 : vector<32x128xf32>
    %c0_3 = arith.constant 0 : index
    %c0_4 = arith.constant 0 : index
    %3 = vector.load %arg3[%c0_3, %c0_4] : memref<32x128xf32, #tpu.memory_space<vmem>>, vector<32x128xf32>
    tpu.vector_store %arg3[%c0_3, %c0_4], %2 {strides = array<i32>} : memref<32x128xf32, #tpu.memory_space<vmem>>, vector<32x128xf32>,
    return
  }
  func.func @transform_0(%arg0: i32) -> (i32, i32) {
    %c0_i32 = arith.constant 0 : i32
    %c0_i32_0 = arith.constant 0 : i32
    return %arg0, %c0_i32 : i32, i32
  }
  func.func @transform_1(%arg0: i32) -> (i32, i32) {
    %c0_i32 = arith.constant 0 : i32
    %c0_i32_0 = arith.constant 0 : i32
    return %arg0, %c0_i32 : i32, i32
  }
  func.func @transform_2(%arg0: i32) -> (i32, i32) {
    %c0_i32 = arith.constant 0 : i32
    %c0_i32_0 = arith.constant 0 : i32
    return %arg0, %c0_i32 : i32, i32
  }
}

</mosaic_0001>

<bundles_post_ra>
// kernel: _encode_impl.4
= control target key start
LH: loop header
LB: loop body
LE: loop exit
PB: predicated region body
PF: predicated region fallthrough
CT: control target
= control target key end

     0   :  { %s153_s0 = inlined_call_operand.vmem [shape: f32[32,128], index: 0, kind: input, shape index: {}]   ;;  %s154_s1 = inlined_call_operand.vmem [shape: f32[1,128], index: 1, kind: input, shape index: {}]   ;;  %s155_s2 = inlined_call_operand.vmem [shape: f32[1,128], index: 2, kind: input, shape index: {}]   ;;  %s156_s3 = inlined_call_operand.vmem [shape: f32[32,128], index: 3, kind: output, shape index: {}]  }
   0x1   :  { %v14_v0 = vld [vmem:[%s153_s0] sm:$0xff]  ;;  %v16_v1 = vld [vmem:[%s153_s0 + $0x10] sm:$0xff]  ;;  %v15_v2 = vld [vmem:[%s153_s0 + $0x8] sm:$0xff] }
   0x2   :  { %20 = vadd.xlane.f32.xlu0 %v14_v0  ;;  %24 = vadd.xlane.f32.xlu1 %v16_v1  ;;  %v17_v3 = vld [vmem:[%s153_s0 + $0x18] sm:$0xff]  ;;  %v93_v33 = vld [vmem:[%s154_s1] ss:$0 sm:$0xff] }
   0x3   :  { %v94_v35 = vld [vmem:[%s155_s2] ss:$0 sm:$0xff] }
   0x6   :  { %22 = vadd.xlane.f32.xlu0 %v15_v2  ;;  %26 = vadd.xlane.f32.xlu1 %v17_v3 }
  0x8b   :  { %v21_v4 = vpop.xlane.xlu0 %20  ;;  %v25_v5 = vpop.xlane.xlu1 %24 }
  0x8c   :  { %v29_v6 = vmul.f32 0.0078125, %v21_v4  ;;  %v31_v7 = vmul.f32 0.0078125, %v25_v5 }
  0x8e   :  { %v33_v8 = vsub.f32 %v14_v0, %v29_v6  ;;  %v35_v9 = vsub.f32 %v16_v1, %v31_v7 }
  0x8f   :  { %v23_v10 = vpop.xlane.xlu0 %22  ;;  %v27_v11 = vpop.xlane.xlu1 %26 }
  0x90   :  { %v30_v12 = vmul.f32 0.0078125, %v23_v10  ;;  %v37_v13 = vmul.f32 %v33_v8, %v33_v8  ;;  %v32_v14 = vmul.f32 0.0078125, %v27_v11  ;;  %v39_v17 = vmul.f32 %v35_v9, %v35_v9 }
  0x92   :  { %v34_v15 = vsub.f32 %v15_v2, %v30_v12  ;;  %41 = vadd.xlane.f32.xlu0 %v37_v13  ;;  %v36_v16 = vsub.f32 %v17_v3, %v32_v14 }
  0x94   :  { %v38_v18 = vmul.f32 %v34_v15, %v34_v15  ;;  %v40_v19 = vmul.f32 %v36_v16, %v36_v16 }
  0x96   :  { %45 = vadd.xlane.f32.xlu0 %v39_v17  ;;  %43 = vadd.xlane.f32.xlu1 %v38_v18 }
  0x9a   :  { %47 = vadd.xlane.f32.xlu1 %v40_v19 }
 0x11b   :  { %v42_v20 = vpop.xlane.xlu0 %41 }
 0x11c   :  { %v49_v21 = vmul.f32 0.0078125, %v42_v20 }
 0x11e   :  { %v53_v22 = vadd.f32 1e-05, %v49_v21 }
 0x11f   :  { %v44_v23 = vpop.xlane.xlu1 %43  ;;  %v46_v24 = vpop.xlane.xlu0 %45 }
 0x120   :  { %95 = vrsqrt.f32 %v53_v22  ;;  %v50_v25 = vmul.f32 0.0078125, %v44_v23  ;;  %v51_v26 = vmul.f32 0.0078125, %v46_v24 }
 0x122   :  { %v54_v27 = vadd.f32 1e-05, %v50_v25  ;;  %v55_v28 = vadd.f32 1e-05, %v51_v26 }
 0x123   :  { %v48_v29 = vpop.xlane.xlu1 %47 }
 0x124   :  { %97 = vrsqrt.f32 %v54_v27  ;;  %v52_v30 = vmul.f32 0.0078125, %v48_v29 }
 0x125   :  { %99 = vrsqrt.f32 %v55_v28 }
 0x126   :  { %v56_v31 = vadd.f32 1e-05, %v52_v30 }
 0x128   :  { %101 = vrsqrt.f32 %v56_v31 }
 0x12d   :  { %v96_v32 = vpop.eup %95 }
 0x12e   :  { %v61_v34 = vmul.f32 %v96_v32, %v33_v8 }
 0x130   :  { %v71_v36 = vmul.f32 %v93_v33, %v61_v34 }
 0x131   :  { %v98_v37 = vpop.eup %97 }
 0x132   :  { %v100_v38 = vpop.eup %99  ;;  %v81_v39 = vadd.f32 %v94_v35, %v71_v36  ;;  %v62_v40 = vmul.f32 %v98_v37, %v34_v15 }
 0x133   :  { %v63_v41 = vmul.f32 %v100_v38, %v35_v9 }
 0x134   :  { %85 = vst [vmem:[%s156_s3] sm:$0xff] %v81_v39  ;;  %v72_v42 = vmul.f32 %v93_v33, %v62_v40 }
 0x135   :  { %v102_v43 = vpop.eup %101  ;;  %v73_v44 = vmul.f32 %v93_v33, %v63_v41 }
 0x136   :  { %v82_v45 = vadd.f32 %v94_v35, %v72_v42  ;;  %v64_v46 = vmul.f32 %v102_v43, %v36_v16 }
 0x137   :  { %v83_v47 = vadd.f32 %v94_v35, %v73_v44 }
 0x138   :  { %86 = vst [vmem:[%s156_s3 + $0x8] sm:$0xff] %v82_v45  ;;  %v74_v48 = vmul.f32 %v93_v33, %v64_v46 }
 0x139   :  { %87 = vst [vmem:[%s156_s3 + $0x10] sm:$0xff] %v83_v47 }
 0x13a   :  { %v84_v49 = vadd.f32 %v94_v35, %v74_v48 }
 0x13c   :  { %88 = vst [vmem:[%s156_s3 + $0x18] sm:$0xff] %v84_v49 }

// kernel: _encode_impl.5
= control target key start
LH: loop header
LB: loop body
LE: loop exit
PB: predicated region body
PF: predicated region fallthrough
CT: control target
= control target key end

     0   :  { %s82_s0 = inlined_call_operand.vmem [shape: f32[32,128], index: 0, kind: input, shape index: {}, may-alias: {0,2}]   ;;  %s83_s1 = inlined_call_operand.vmem [shape: f32[32,128], index: 1, kind: input, shape index: {}]   ;;  %s84_s2 = inlined_call_operand.vmem [shape: f32[32,128], index: 2, kind: output, shape index: {}, may-alias: {0,2}]  }
   0x1   :  { %v11_v0 = vld [vmem:[%s82_s0] sm:$0xff]  ;;  %v12_v2 = vld [vmem:[%s82_s0 + $0x8] sm:$0xff]  ;;  %v13_v5 = vld [vmem:[%s82_s0 + $0x10] sm:$0xff] }
   0x2   :  { %v15_v1 = vld [vmem:[%s83_s1] sm:$0xff]  ;;  %v16_v4 = vld [vmem:[%s83_s1 + $0x8] sm:$0xff]  ;;  %v17_v6 = vld [vmem:[%s83_s1 + $0x10] sm:$0xff] }
   0x3   :  { %v19_v3 = vadd.f32 %v15_v1, %v11_v0  ;;  %v20_v7 = vadd.f32 %v16_v4, %v12_v2  ;;  %v21_v8 = vadd.f32 %v17_v6, %v13_v5  ;;  %v14_v9 = vld [vmem:[%s82_s0 + $0x18] sm:$0xff] }
   0x4   :  { %v18_v10 = vld [vmem:[%s83_s1 + $0x18] sm:$0xff] }
   0x5   :  { %23 = vst [vmem:[%s84_s2] sm:$0xff] %v19_v3  ;;  %v22_v11 = vadd.f32 %v18_v10, %v14_v9  ;;  %24 = vst [vmem:[%s84_s2 + $0x8] sm:$0xff] %v20_v7 }
   0x6   :  { %25 = vst [vmem:[%s84_s2 + $0x10] sm:$0xff] %v21_v8 }
   0x7   :  { %26 = vst [vmem:[%s84_s2 + $0x18] sm:$0xff] %v22_v11 }

</bundles_post_ra>
